<compile_context>
chip_gen: v6e
topology: v6e:2x2x1
jax: 0.10.0
libtpu: 0.0.40
codegen_flags: <defaults>
</compile_context>

<pallas_src>
import numpy as np

import jax
import jax.numpy as jnp
from jax import lax
from jax.experimental import pallas as pl
from jax.experimental.pallas import tpu as pltpu


def _round_up(x: int, m: int) -> int:
    return ((x + m - 1) // m) * m


# --------------------------------------------------------------------------
# Small path: whole problem in one VMEM block, no padding, no grid.
# --------------------------------------------------------------------------
def _linear_small_kernel(x_ref, w_ref, b_ref, o_ref):
    # x: (B, L), w: (O, L), b: (1, O) — contract last dims => x @ W.T (no
    # transpose materialized), then bias add on the VPU.
    y = lax.dot_general(
        x_ref[...],
        w_ref[...],
        dimension_numbers=(((1,), (1,)), ((), ())),
        preferred_element_type=jnp.float32,
    )
    o_ref[...] = (y + b_ref[...]).astype(o_ref.dtype)


def _decoder_forward_small(x, weight, bias):
    batch = x.shape[0]
    out_features = weight.shape[0]
    return pl.pallas_call(
        _linear_small_kernel,
        out_shape=jax.ShapeDtypeStruct((batch, out_features), x.dtype),
    )(x, weight, bias.reshape(1, out_features))


# --------------------------------------------------------------------------
# Tiled path: (M, N, K) grid, bias as a (1, tn) input, f32 VMEM accumulator.
# --------------------------------------------------------------------------
def _linear_tiled_kernel(x_ref, w_ref, b_ref, o_ref, acc_ref):
    k = pl.program_id(2)

    @pl.when(k == 0)
    def _():
        acc_ref[...] = jnp.zeros_like(acc_ref)

    acc_ref[...] += lax.dot_general(
        x_ref[...],
        w_ref[...],
        dimension_numbers=(((1,), (1,)), ((), ())),
        preferred_element_type=jnp.float32,
    )

    @pl.when(k == pl.num_programs(2) - 1)
    def _():
        o_ref[...] = (acc_ref[...] + b_ref[...]).astype(o_ref.dtype)


def prepare_decoder_params(weight, bias, *, tn=128):
    """Pad the static nn.Linear params once (hoisted out of the hot path).

    weight: (O, L) -> (o_pad, L)   bias: (O,) -> (1, o_pad), o_pad = ceil(O/tn)*tn
    """
    out_features = weight.shape[0]
    o_pad = _round_up(out_features, tn)
    if o_pad != out_features:
        weight = jnp.pad(weight, ((0, o_pad - out_features), (0, 0)))
        bias = jnp.pad(bias, (0, o_pad - out_features))
    return weight, bias.reshape(1, o_pad)


def _pick_tm(batch: int, cap: int = 256) -> int:
    """Largest tile height <= cap that divides round_up(batch, 8) (avoids
    pathological batch padding, e.g. batch=260 -> tm=88, not b_pad=512)."""
    b8 = _round_up(batch, 8)
    if b8 <= cap:
        return b8
    for d in range(cap, 63, -8):
        if b8 % d == 0:
            return d
    return 128  # fall back: at most one partial tile of padding


def _pick_tk(latent: int) -> int:
    """Keep the full latent resident for moderate K; K-block for huge latent
    so the per-step VMEM footprint stays safe on v7x (64 MiB physical)."""
    if latent <= 2048:
        return latent
    for tk in (2048, 1024, 512, 256, 128):
        if latent % tk == 0:
            return tk
    return latent  # awkward size: keep resident (block K dim == full array dim)


def decoder_forward_tiled(x, weight_padded, bias_padded, out_features, *, tn=128):
    """Tiled y = x @ W.T + b with pre-padded params (see prepare_decoder_params)."""
    batch, latent = x.shape
    o_pad = weight_padded.shape[0]

    tm = _pick_tm(batch)
    b_pad = _round_up(_round_up(batch, 8), tm)
    tk = _pick_tk(latent)
    nk = latent // tk

    if b_pad != batch:
        # Single jnp.pad on the batch axis only; the contraction dim is never
        # padded at runtime.
        x = jnp.pad(x, ((0, b_pad - batch), (0, 0)))

    grid = (b_pad // tm, o_pad // tn, nk)

    out = pl.pallas_call(
        _linear_tiled_kernel,
        out_shape=jax.ShapeDtypeStruct((b_pad, o_pad), x.dtype),
        grid=grid,
        in_specs=[
            pl.BlockSpec((tm, tk), lambda i, j, k: (i, k)),   # x tile
            pl.BlockSpec((tn, tk), lambda i, j, k: (j, k)),   # W tile (native layout)
            pl.BlockSpec((1, tn), lambda i, j, k: (0, j)),    # bias tile
        ],
        out_specs=pl.BlockSpec((tm, tn), lambda i, j, k: (i, j)),
        scratch_shapes=[pltpu.VMEM((tm, tn), jnp.float32)],
        compiler_params=pltpu.CompilerParams(
            dimension_semantics=("parallel", "parallel", "arbitrary"),
        ),
    )(x, weight_padded, bias_padded)

    if (b_pad, o_pad) != (batch, out_features):
        out = out[:batch, :out_features]
    return out


# --------------------------------------------------------------------------
# Public forward: dispatch on problem size.
# --------------------------------------------------------------------------
def _fits_single_block(batch, latent, out_features, budget_bytes=4 * 1024 * 1024):
    b8 = _round_up(batch, 8)
    l128 = _round_up(latent, 128)
    o128 = _round_up(out_features, 128)
    footprint = 4 * (b8 * l128 + o128 * l128 + o128 + b8 * o128)
    return footprint <= budget_bytes


def decoder_forward(x, weight, bias):
    """Pallas equivalent of Decoder.forward (a single nn.Linear): x @ W.T + b."""
    batch, latent = x.shape
    out_features = weight.shape[0]
    if _fits_single_block(batch, latent, out_features):
        return _decoder_forward_small(x, weight, bias)
    # For repeated large-shape calls, hoist prepare_decoder_params() to param
    # init and call decoder_forward_tiled directly (params are static).
    w_p, b_p = prepare_decoder_params(weight, bias)
    return decoder_forward_tiled(x, w_p, b_p, out_features)


if __name__ == "__main__":
    # Shapes consistent with the toy script: batch_size = 100, output_size = 2,
    # and a small latent size feeding the decoder.
    batch_size, latent_size, output_size = 100, 16, 2

    key = jax.random.PRNGKey(0)
    k_x, k_w, k_b = jax.random.split(key, 3)

    x = jax.random.normal(k_x, (batch_size, latent_size), dtype=jnp.float32)
    bound = 1.0 / (latent_size ** 0.5)
    weight = jax.random.uniform(
        k_w, (output_size, latent_size), jnp.float32, minval=-bound, maxval=bound
    )
    bias = jax.random.uniform(
        k_b, (output_size,), jnp.float32, minval=-bound, maxval=bound
    )

    # Primary check: the module's actual shapes (single-block fast path).
    y = jax.block_until_ready(jax.jit(decoder_forward)(x, weight, bias))
    y_ref = x @ weight.T + bias
    assert y.shape == (batch_size, output_size)
    assert jnp.allclose(y, y_ref, atol=1e-5, rtol=1e-5), "small-path mismatch"

    # Secondary sanity check: tiled path (batch/output tiling, K-axis
    # accumulator, hoisted param padding, divisor-based tm selection).
    B2, L2, O2 = 260, 4096, 256
    k_x2, k_w2, k_b2 = jax.random.split(jax.random.PRNGKey(1), 3)
    x2 = jax.random.normal(k_x2, (B2, L2), dtype=jnp.float32)
    bnd2 = 1.0 / (L2 ** 0.5)
    w2 = jax.random.uniform(k_w2, (O2, L2), jnp.float32, minval=-bnd2, maxval=bnd2)
    bias2 = jax.random.uniform(k_b2, (O2,), jnp.float32, minval=-bnd2, maxval=bnd2)

    w2_p, b2_p = prepare_decoder_params(w2, bias2)  # hoisted: pad once
    y2 = jax.block_until_ready(
        jax.jit(decoder_forward_tiled, static_argnums=3)(x2, w2_p, b2_p, O2)
    )
    y2_ref = (
        np.asarray(x2, np.float64) @ np.asarray(w2, np.float64).T
        + np.asarray(bias2, np.float64)
    )
    assert y2.shape == (B2, O2)
    assert jnp.allclose(y2, y2_ref.astype(np.float32), atol=2e-3, rtol=2e-3), (
        "tiled-path mismatch"
    )

    print("KERNEL_OK")
</pallas_src>

<mosaic_0001>
module attributes {stable_mosaic.version = 11 : i64} {
  func.func @_linear_small_kernel(%arg0: memref<100x16xf32, #tpu.memory_space<vmem>>, %arg1: memref<2x16xf32, #tpu.memory_space<vmem>>, %arg2: memref<1x2xf32, #tpu.memory_space<vmem>>, %arg3: memref<100x2xf32, #tpu.memory_space<vmem>>) attributes {dimension_semantics = [], scalar_prefetch = 0 : i64, scratch_operands = 0 : i64, tpu.core_type = #tpu.core_type<tc>} {
    %c0 = arith.constant 0 : index
    %c0_0 = arith.constant 0 : index
    %0 = vector.load %arg0[%c0, %c0_0] : memref<100x16xf32, #tpu.memory_space<vmem>>, vector<100x16xf32>
    %c0_1 = arith.constant 0 : index
    %c0_2 = arith.constant 0 : index
    %1 = vector.load %arg1[%c0_1, %c0_2] : memref<2x16xf32, #tpu.memory_space<vmem>>, vector<2x16xf32>
    %cst = arith.constant dense<0.000000e+00> : vector<100x2xf32>
    %2 = tpu.matmul %0, %1, %cst {dimension_numbers = #tpu.dot_dimension_numbers<[1], [1], [0], [0], [0, 0, 1, 0], [], []>} : vector<100x16xf32>, vector<2x16xf32>, vector<100x2xf32> -> vector<100x2xf32>
    %c0_3 = arith.constant 0 : index
    %c0_4 = arith.constant 0 : index
    %3 = vector.load %arg2[%c0_3, %c0_4] : memref<1x2xf32, #tpu.memory_space<vmem>>, vector<1x2xf32>
    %4 = vector.broadcast %3 : vector<1x2xf32> to vector<100x2xf32>
    %5 = arith.addf %2, %4 : vector<100x2xf32>
    %c0_5 = arith.constant 0 : index
    %c0_6 = arith.constant 0 : index
    %6 = vector.load %arg3[%c0_5, %c0_6] : memref<100x2xf32, #tpu.memory_space<vmem>>, vector<100x2xf32>
    tpu.vector_store %arg3[%c0_5, %c0_6], %5 {strides = array<i32>} : memref<100x2xf32, #tpu.memory_space<vmem>>, vector<100x2xf32>,
    return
  }
}

</mosaic_0001>

<bundles_post_ra>
// kernel: decoder_forward.1
= control target key start
LH: loop header
LB: loop body
LE: loop exit
PB: predicated region body
PF: predicated region fallthrough
CT: control target
= control target key end

     0   :  { %vm35_vm0 = vcmask 130048   ;;  %v301_v0 = vmov 0.0   ;;  %vm302_vm1 = vmmov 0   ;;  %vm208_vm2 = vcmask 15360   ;;  %s447_s1 = inlined_call_operand.vmem [shape: f32[2,16], index: 1, kind: input, shape index: {}]   ;;  %s448_s0 = inlined_call_operand.vmem [shape: f32[100,16], index: 0, kind: input, shape index: {}]   ;;  %s449_s2 = inlined_call_operand.vmem [shape: f32[1,2], index: 2, kind: input, shape index: {}]   ;;  %s450_s3 = inlined_call_operand.vmem [shape: f32[100,2], index: 3, kind: output, shape index: {}]  }
   0x1   :  { %256 = vmatprep.subr.mxu0 %v301_v0  ;;  %v27_v1 = vld [vmem:[%s447_s1] sm:$0x3]  ;;  %297 = vmatprep.subr.mxu1 %v301_v0  ;;  %v21_v3 = vld [vmem:[%s448_s0 + $0x38] sm:$0xff]  ;;  %v15_v4 = vld [vmem:[%s448_s0 + $0x8] sm:$0xff]  ;;  %vm221_vm3 = vcmask 11264  }
   0x2   :  { %257 = vmatpush3.xpose.msk.msra.mxu0 %vm35_vm0, %v27_v1  ;;  %298 = vmatpush3.xpose.msk.msra.mxu1 %vm35_vm0, %v27_v1  ;;  %v14_v2 = vld [vmem:[%s448_s0] sm:$0xff]  ;;  %v16_v6 = vld [vmem:[%s448_s0 + $0x10] sm:$0xff]  ;;  %v23_v7 = vld [vmem:[%s448_s0 + $0x48] sm:$0xff] }
   0x3   :  { %258 = vmatprep.mubr.msk.f32.mxu0 %vm302_vm1, %v301_v0  ;;  %279 = vmatprep.mubr.msk.f32.mxu1 %vm302_vm1, %v301_v0  ;;  %v22_v5 = vld [vmem:[%s448_s0 + $0x40] sm:$0xff]  ;;  %v17_v8 = vld [vmem:[%s448_s0 + $0x18] sm:$0xff]  ;;  %v24_v9 = vld [vmem:[%s448_s0 + $0x50] sm:$0xff] }
   0x4   :  { %v18_v10 = vld [vmem:[%s448_s0 + $0x20] sm:$0xff]  ;;  %v25_v11 = vld [vmem:[%s448_s0 + $0x58] sm:$0xff]  ;;  %v19_v12 = vld [vmem:[%s448_s0 + $0x28] sm:$0xff] }
   0x5   :  { %259 = vmatmul.mubr.msk.f32.vlgmr.msra.gmra.mxu0 %vm35_vm0, %v14_v2  ;;  %280 = vmatmul.mubr.msk.f32.vlgmr.msra.gmra.mxu1 %vm35_vm0, %v21_v3  ;;  %v26_v13 = vld [vmem:[%s448_s0 + $0x60] sm:$0xf]  ;;  %v20_v14 = vld [vmem:[%s448_s0 + $0x30] sm:$0xff] }
   0x6   :  { %261 = vmatprep.mubr.msk.f32.mxu0 %vm302_vm1, %v301_v0  ;;  %282 = vmatprep.mubr.msk.f32.mxu1 %vm302_vm1, %v301_v0  ;;  %v227_v15 = vld [vmem:[%s449_s2] ss:$0 sm:$0xff] }
   0x9   :  { %262 = vmatmul.mubr.msk.f32.gmra.mxu0 %vm35_vm0, %v15_v4  ;;  %283 = vmatmul.mubr.msk.f32.gmra.mxu1 %vm35_vm0, %v22_v5 }
   0xa   :  { %264 = vmatprep.mubr.msk.f32.mxu0 %vm302_vm1, %v301_v0  ;;  %285 = vmatprep.mubr.msk.f32.mxu1 %vm302_vm1, %v301_v0 }
   0xd   :  { %265 = vmatmul.mubr.msk.f32.gmra.mxu0 %vm35_vm0, %v16_v6  ;;  %286 = vmatmul.mubr.msk.f32.gmra.mxu1 %vm35_vm0, %v23_v7 }
   0xe   :  { %267 = vmatprep.mubr.msk.f32.mxu0 %vm302_vm1, %v301_v0  ;;  %288 = vmatprep.mubr.msk.f32.mxu1 %vm302_vm1, %v301_v0 }
  0x11   :  { %268 = vmatmul.mubr.msk.f32.gmra.mxu0 %vm35_vm0, %v17_v8  ;;  %289 = vmatmul.mubr.msk.f32.gmra.mxu1 %vm35_vm0, %v24_v9 }
  0x12   :  { %270 = vmatprep.mubr.msk.f32.mxu0 %vm302_vm1, %v301_v0  ;;  %291 = vmatprep.mubr.msk.f32.mxu1 %vm302_vm1, %v301_v0 }
  0x15   :  { %271 = vmatmul.mubr.msk.f32.gmra.mxu0 %vm35_vm0, %v18_v10  ;;  %292 = vmatmul.mubr.msk.f32.gmra.mxu1 %vm35_vm0, %v25_v11 }
  0x16   :  { %273 = vmatprep.mubr.msk.f32.mxu0 %vm302_vm1, %v301_v0  ;;  %294 = vmatprep.mubr.msk.f32.mxu1 %vm302_vm1, %v301_v0 }
  0x19   :  { %274 = vmatmul.mubr.msk.f32.gmra.mxu0 %vm35_vm0, %v19_v12  ;;  %295 = vmatmul.mubr.msk.f32.gmra.mxu1 %vm35_vm0, %v26_v13 }
  0x1a   :  { %276 = vmatprep.mubr.msk.f32.mxu0 %vm302_vm1, %v301_v0 }
  0x1d   :  { %277 = vmatmul.mubr.msk.f32.gmra.mxu0 %vm35_vm0, %v20_v14 }
  0xc5   :  { %v144_v16 = vpop.f32.mrf.mxu0  ;;  %v179_v17 = vpop.f32.mrf.mxu1 }
  0xc6   :  { %v145_v18 = vadd.f32 %v227_v15, %v144_v16  ;;  %v180_v19 = vadd.f32 %v227_v15, %v179_v17 }
  0xc7   :  { %v260_v20 = vpop.f32.mrf.mxu0  ;;  %v281_v21 = vpop.f32.mrf.mxu1 }
  0xc8   :  { %209 = vst.msk [vmem:[%s450_s3] sm:$0xff] %vm208_vm2, %v145_v18  ;;  %216 = vst.msk [vmem:[%s450_s3 + $0x38] sm:$0xff] %vm208_vm2, %v180_v19 }
  0xc9   :  { %v149_v22 = vpop.f32.mrf.mxu0  ;;  %v184_v23 = vpop.f32.mrf.mxu1 }
  0xca   :  { %v150_v24 = vadd.f32 %v227_v15, %v149_v22  ;;  %v185_v25 = vadd.f32 %v227_v15, %v184_v23 }
  0xcb   :  { %v263_v26 = vpop.f32.mrf.mxu0  ;;  %v284_v27 = vpop.f32.mrf.mxu1 }
  0xcc   :  { %210 = vst.msk [vmem:[%s450_s3 + $0x8] sm:$0xff] %vm208_vm2, %v150_v24  ;;  %217 = vst.msk [vmem:[%s450_s3 + $0x40] sm:$0xff] %vm208_vm2, %v185_v25 }
  0xcd   :  { %v154_v28 = vpop.f32.mrf.mxu0  ;;  %v189_v29 = vpop.f32.mrf.mxu1 }
  0xce   :  { %v155_v30 = vadd.f32 %v227_v15, %v154_v28  ;;  %v190_v31 = vadd.f32 %v227_v15, %v189_v29 }
  0xcf   :  { %v266_v32 = vpop.f32.mrf.mxu0  ;;  %v287_v33 = vpop.f32.mrf.mxu1 }
  0xd0   :  { %211 = vst.msk [vmem:[%s450_s3 + $0x10] sm:$0xff] %vm208_vm2, %v155_v30  ;;  %218 = vst.msk [vmem:[%s450_s3 + $0x48] sm:$0xff] %vm208_vm2, %v190_v31 }
  0xd1   :  { %v159_v34 = vpop.f32.mrf.mxu0  ;;  %v194_v35 = vpop.f32.mrf.mxu1 }
  0xd2   :  { %v160_v36 = vadd.f32 %v227_v15, %v159_v34  ;;  %v195_v37 = vadd.f32 %v227_v15, %v194_v35 }
  0xd3   :  { %v269_v38 = vpop.f32.mrf.mxu0  ;;  %v290_v39 = vpop.f32.mrf.mxu1 }
  0xd4   :  { %212 = vst.msk [vmem:[%s450_s3 + $0x18] sm:$0xff] %vm208_vm2, %v160_v36  ;;  %219 = vst.msk [vmem:[%s450_s3 + $0x50] sm:$0xff] %vm208_vm2, %v195_v37 }
  0xd5   :  { %v164_v40 = vpop.f32.mrf.mxu0  ;;  %v199_v41 = vpop.f32.mrf.mxu1 }
  0xd6   :  { %v165_v42 = vadd.f32 %v227_v15, %v164_v40  ;;  %v200_v43 = vadd.f32 %v227_v15, %v199_v41 }
  0xd7   :  { %v272_v44 = vpop.f32.mrf.mxu0  ;;  %v293_v45 = vpop.f32.mrf.mxu1 }
  0xd8   :  { %213 = vst.msk [vmem:[%s450_s3 + $0x20] sm:$0xff] %vm208_vm2, %v165_v42  ;;  %220 = vst.msk [vmem:[%s450_s3 + $0x58] sm:$0xff] %vm208_vm2, %v200_v43 }
  0xd9   :  { %v169_v46 = vpop.f32.mrf.mxu0  ;;  %v204_v47 = vpop.f32.mrf.mxu1 }
  0xda   :  { %v170_v48 = vadd.f32 %v227_v15, %v169_v46  ;;  %v205_v49 = vadd.f32 %v227_v15, %v204_v47 }
  0xdb   :  { %v275_v50 = vpop.f32.mrf.mxu0  ;;  %v296_v51 = vpop.f32.mrf.mxu1 }
  0xdc   :  { %214 = vst.msk [vmem:[%s450_s3 + $0x28] sm:$0xff] %vm208_vm2, %v170_v48 }
  0xdd   :  { %222 = vst.msk [vmem:[%s450_s3 + $0x60] sm:$0xf] %vm221_vm3, %v205_v49  ;;  %v174_v52 = vpop.f32.mrf.mxu0 }
  0xde   :  { %v175_v53 = vadd.f32 %v227_v15, %v174_v52 }
  0xdf   :  { %v278_v54 = vpop.f32.mrf.mxu0 }
  0xe0   :  { %215 = vst.msk [vmem:[%s450_s3 + $0x30] sm:$0xff] %vm208_vm2, %v175_v53 }

</bundles_post_ra>
